<compile_context>
chip_gen: v7x
topology: tpu7x:2x2x1
jax: 0.10.0
libtpu: 0.0.40
codegen_flags: <defaults>
</compile_context>

<pallas_src>
import functools

import jax
import jax.numpy as jnp
from jax.experimental import pallas as pl
from jax.experimental.pallas import tpu as pltpu


def _round_up(x, m):
    return (x + m - 1) // m * m


# ----------------------------------------------------------------------------
# Core cell math (shared by the single-step and sequence kernels).
# ----------------------------------------------------------------------------
def _rnn_cell(x_in, h_in, w1_ref, wg_ref, w2_ref, b_ref):
    f32 = jnp.float32
    H = h_in.shape[-1]
    QPAD = w2_ref.shape[-1]

    b1 = b_ref[0:1, 0:H]          # fc1 bias
    bg = b_ref[1:2, :]            # fused GRU bias  [b_r | b_z | b_in | b_hn]
    b2p = b_ref[2:3, 0:QPAD]      # zero-padded fc2 bias

    # ---- fc1 + ReLU --------------------------------------------------------
    x = jnp.dot(x_in, w1_ref[...], preferred_element_type=f32) + b1
    x = jnp.maximum(x, 0.0)

    # ---- fused GRU: [x | h] @ W_gru -> [gr | gz | x@W_in | h@W_hn] ----------
    xh = jnp.concatenate([x, h_in], axis=-1)                       # [B, 2H]
    g = jnp.dot(xh, wg_ref[...], preferred_element_type=f32) + bg  # [B, 4H]

    rz = jax.nn.sigmoid(g[:, 0:2 * H])
    r = rz[:, 0:H]
    z = rz[:, H:2 * H]
    n = jnp.tanh(g[:, 2 * H:3 * H] + r * g[:, 3 * H:4 * H])
    h_new = (1.0 - z) * n + z * h_in

    # ---- fc2 (zero-padded to lane-dense width) + pack output slab ----------
    q = jnp.dot(h_new, w2_ref[...], preferred_element_type=f32) + b2p
    out_slab = jnp.concatenate([h_new, q], axis=-1)                # [B, H+QPAD] (=128)
    return h_new, out_slab


# ----------------------------------------------------------------------------
# Single-step kernel (matches the module's forward exactly).
# ----------------------------------------------------------------------------
def rnn_agent_kernel(x_ref, h_ref, w1_ref, wg_ref, w2_ref, b_ref, out_ref):
    _, out_slab = _rnn_cell(x_ref[...], h_ref[...], w1_ref, wg_ref, w2_ref, b_ref)
    out_ref[...] = out_slab.astype(out_ref.dtype)


@functools.partial(jax.jit, static_argnames=("n_actions",))
def rnn_agent_forward(inputs, hidden_state, packed, *, n_actions):
    """inputs: [B, input_dim] f32, hidden_state: [B, H] f32 -> (q, h_new)."""
    B = inputs.shape[0]
    H = hidden_state.shape[-1]
    OUT_W = H + packed["w2p"].shape[-1]

    vmem = pl.BlockSpec(memory_space=pltpu.MemorySpace.VMEM)
    out = pl.pallas_call(
        rnn_agent_kernel,
        out_shape=jax.ShapeDtypeStruct((B, OUT_W), jnp.float32),
        in_specs=[vmem] * 6,
        out_specs=vmem,
    )(inputs, hidden_state, packed["w1"], packed["w_gru"], packed["w2p"],
      packed["bias"])

    h_new = out[:, 0:H]
    q = out[:, H:H + n_actions]
    return q, h_new


# ----------------------------------------------------------------------------
# Sequence kernel: time grid axis, weights resident in VMEM, h carried in scratch.
# ----------------------------------------------------------------------------
def rnn_agent_seq_kernel(x_ref, h0_ref, w1_ref, wg_ref, w2_ref, b_ref,
                         out_ref, h_scr):
    @pl.when(pl.program_id(0) == 0)
    def _():
        h_scr[...] = h0_ref[...]

    h_new, out_slab = _rnn_cell(x_ref[...], h_scr[...], w1_ref, wg_ref, w2_ref,
                                b_ref)
    h_scr[...] = h_new
    out_ref[...] = out_slab.astype(out_ref.dtype)


@functools.partial(jax.jit, static_argnames=("n_actions",))
def rnn_agent_forward_seq(inputs_seq, h0, packed, *, n_actions):
    """inputs_seq: [T, B, input_dim], h0: [B, H] -> (q_seq [T,B,A], h_last [B,H])."""
    T, B, Din = inputs_seq.shape
    H = h0.shape[-1]
    QPAD = packed["w2p"].shape[-1]
    OUT_W = H + QPAD

    grid_spec = pltpu.PrefetchScalarGridSpec(
        num_scalar_prefetch=0,
        grid=(T,),
        in_specs=[
            pl.BlockSpec((None, B, Din), lambda t: (t, 0, 0)),       # per-step input
            pl.BlockSpec((B, H), lambda t: (0, 0)),                  # h0 (read at t=0)
            pl.BlockSpec(packed["w1"].shape, lambda t: (0, 0)),      # resident weights
            pl.BlockSpec(packed["w_gru"].shape, lambda t: (0, 0)),
            pl.BlockSpec(packed["w2p"].shape, lambda t: (0, 0)),
            pl.BlockSpec(packed["bias"].shape, lambda t: (0, 0)),
        ],
        out_specs=pl.BlockSpec((None, B, OUT_W), lambda t: (t, 0, 0)),
        scratch_shapes=[pltpu.VMEM((B, H), jnp.float32)],            # carried hidden
    )

    out = pl.pallas_call(
        rnn_agent_seq_kernel,
        out_shape=jax.ShapeDtypeStruct((T, B, OUT_W), jnp.float32),
        grid_spec=grid_spec,
        compiler_params=pltpu.CompilerParams(dimension_semantics=("arbitrary",)),
    )(inputs_seq, h0, packed["w1"], packed["w_gru"], packed["w2p"], packed["bias"])

    q_seq = out[:, :, H:H + n_actions]
    h_last = out[-1, :, 0:H]
    return q_seq, h_last


# ----------------------------------------------------------------------------
# Parameters (PyTorch-style raw layouts) and kernel-side packing.
# ----------------------------------------------------------------------------
def init_params(key, input_dim, hidden_dim, n_actions):
    ks = jax.random.split(key, 8)
    u = lambda k, shape, s: jax.random.uniform(k, shape, jnp.float32, -s, s)
    s1 = 1.0 / input_dim ** 0.5
    sh = 1.0 / hidden_dim ** 0.5
    return dict(
        fc1_w=u(ks[0], (hidden_dim, input_dim), s1),      # [H, Din]
        fc1_b=u(ks[1], (hidden_dim,), s1),
        w_ih=u(ks[2], (3 * hidden_dim, hidden_dim), sh),  # gate order (r, z, n)
        w_hh=u(ks[3], (3 * hidden_dim, hidden_dim), sh),
        b_ih=u(ks[4], (3 * hidden_dim,), sh),
        b_hh=u(ks[5], (3 * hidden_dim,), sh),
        fc2_w=u(ks[6], (n_actions, hidden_dim), sh),      # [A, H]
        fc2_b=u(ks[7], (n_actions,), sh),
    )


def pack_params(raw, hidden_dim, n_actions):
    """Fuse/pad PyTorch-layout params into the 4 kernel operands (+ x, h)."""
    f32 = jnp.float32
    H, A = hidden_dim, n_actions
    qpad = _round_up(H + A, 128) - H              # pad q lanes so output slab is 128-wide
    assert A <= qpad <= 4 * H

    w1 = raw["fc1_w"].T.astype(f32)               # [Din, H]

    w_ih, w_hh = raw["w_ih"], raw["w_hh"]
    Wir, Wiz, Win = w_ih[0:H].T, w_ih[H:2 * H].T, w_ih[2 * H:3 * H].T
    Whr, Whz, Whn = w_hh[0:H].T, w_hh[H:2 * H].T, w_hh[2 * H:3 * H].T
    zH = jnp.zeros((H, H), f32)
    # rows 0:H multiply x, rows H:2H multiply h; column groups -> [r | z | xWin | hWhn]
    w_gru = jnp.concatenate(
        [jnp.concatenate([Wir, Wiz, Win, zH], axis=1),
         jnp.concatenate([Whr, Whz, zH, Whn], axis=1)], axis=0).astype(f32)  # [2H, 4H]

    b_ih, b_hh = raw["b_ih"], raw["b_hh"]
    b_gru = jnp.concatenate([
        b_ih[0:H] + b_hh[0:H],            # r bias (pre-summed)
        b_ih[H:2 * H] + b_hh[H:2 * H],    # z bias (pre-summed)
        b_ih[2 * H:3 * H],                # b_in
        b_hh[2 * H:3 * H],                # b_hn (kept separate: r * (hW_hn + b_hn))
    ])

    w2p = jnp.zeros((H, qpad), f32).at[:, 0:A].set(raw["fc2_w"].T)
    b2p = jnp.zeros((qpad,), f32).at[0:A].set(raw["fc2_b"])

    bias = jnp.zeros((3, 4 * H), f32)
    bias = bias.at[0, 0:H].set(raw["fc1_b"])
    bias = bias.at[1, :].set(b_gru)
    bias = bias.at[2, 0:qpad].set(b2p)

    return dict(w1=w1, w_gru=w_gru, w2p=w2p, bias=bias)


# ----------------------------------------------------------------------------
# Pure-JAX reference matching the PyTorch module.
# ----------------------------------------------------------------------------
def reference_forward(inputs, h, p):
    H = h.shape[-1]
    x = jax.nn.relu(inputs @ p["fc1_w"].T + p["fc1_b"])
    Wir, Wiz, Win = p["w_ih"][0:H], p["w_ih"][H:2 * H], p["w_ih"][2 * H:3 * H]
    Whr, Whz, Whn = p["w_hh"][0:H], p["w_hh"][H:2 * H], p["w_hh"][2 * H:3 * H]
    bir, biz, bin_ = p["b_ih"][0:H], p["b_ih"][H:2 * H], p["b_ih"][2 * H:3 * H]
    bhr, bhz, bhn = p["b_hh"][0:H], p["b_hh"][H:2 * H], p["b_hh"][2 * H:3 * H]
    r = jax.nn.sigmoid(x @ Wir.T + bir + h @ Whr.T + bhr)
    z = jax.nn.sigmoid(x @ Wiz.T + biz + h @ Whz.T + bhz)
    n = jnp.tanh(x @ Win.T + bin_ + r * (h @ Whn.T + bhn))
    h_new = (1.0 - z) * n + z * h
    q = h_new @ p["fc2_w"].T + p["fc2_b"]
    return q, h_new


if __name__ == "__main__":
    B, INPUT_DIM, HIDDEN, N_ACTIONS, T = 8, 40, 64, 19, 6

    key = jax.random.PRNGKey(0)
    k_in, k_h, k_p, k_seq = jax.random.split(key, 4)

    inputs = jax.random.normal(k_in, (B, INPUT_DIM), jnp.float32)
    hidden = jax.random.normal(k_h, (B, HIDDEN), jnp.float32)
    raw = init_params(k_p, INPUT_DIM, HIDDEN, N_ACTIONS)
    packed = pack_params(raw, HIDDEN, N_ACTIONS)

    # ---- single-step (the module's forward) --------------------------------
    q, h = rnn_agent_forward(inputs, hidden, packed, n_actions=N_ACTIONS)
    jax.block_until_ready((q, h))

    q_ref, h_ref = reference_forward(inputs, hidden, raw)
    assert q.shape == (B, N_ACTIONS) and h.shape == (B, HIDDEN)
    assert jnp.allclose(q, q_ref, atol=1e-4, rtol=1e-4)
    assert jnp.allclose(h, h_ref, atol=1e-4, rtol=1e-4)

    # ---- multi-step (time grid axis, weights stay VMEM-resident) -----------
    inputs_seq = jax.random.normal(k_seq, (T, B, INPUT_DIM), jnp.float32)
    q_seq, h_last = rnn_agent_forward_seq(inputs_seq, hidden, packed,
                                          n_actions=N_ACTIONS)
    jax.block_until_ready((q_seq, h_last))

    h_r = hidden
    q_steps = []
    for t in range(T):
        q_t, h_r = reference_forward(inputs_seq[t], h_r, raw)
        q_steps.append(q_t)
    q_seq_ref = jnp.stack(q_steps)
    assert q_seq.shape == (T, B, N_ACTIONS) and h_last.shape == (B, HIDDEN)
    assert jnp.allclose(q_seq, q_seq_ref, atol=1e-4, rtol=1e-4)
    assert jnp.allclose(h_last, h_r, atol=1e-4, rtol=1e-4)

    print("KERNEL_OK")
</pallas_src>

<mosaic_0001>
module attributes {stable_mosaic.version = 11 : i64} {
  func.func @rnn_agent_kernel(%arg0: memref<8x40xf32, #tpu.memory_space<vmem>>, %arg1: memref<8x64xf32, #tpu.memory_space<vmem>>, %arg2: memref<40x64xf32, #tpu.memory_space<vmem>>, %arg3: memref<128x256xf32, #tpu.memory_space<vmem>>, %arg4: memref<64x64xf32, #tpu.memory_space<vmem>>, %arg5: memref<3x256xf32, #tpu.memory_space<vmem>>, %arg6: memref<8x128xf32, #tpu.memory_space<vmem>>) attributes {dimension_semantics = [], scalar_prefetch = 0 : i64, scratch_operands = 0 : i64, tpu.core_type = #tpu.core_type<tc>} {
    %c0 = arith.constant 0 : index
    %c0_0 = arith.constant 0 : index
    %0 = vector.load %arg0[%c0, %c0_0] : memref<8x40xf32, #tpu.memory_space<vmem>>, vector<8x40xf32>
    %c0_1 = arith.constant 0 : index
    %c0_2 = arith.constant 0 : index
    %1 = vector.load %arg1[%c0_1, %c0_2] : memref<8x64xf32, #tpu.memory_space<vmem>>, vector<8x64xf32>
    %c0_3 = arith.constant 0 : index
    %c0_4 = arith.constant 0 : index
    %2 = vector.load %arg5[%c0_3, %c0_4] : memref<3x256xf32, #tpu.memory_space<vmem>>, vector<1x64xf32>
    %c1 = arith.constant 1 : index
    %c0_5 = arith.constant 0 : index
    %3 = vector.load %arg5[%c1, %c0_5] : memref<3x256xf32, #tpu.memory_space<vmem>>, vector<1x256xf32>
    %c2 = arith.constant 2 : index
    %c0_6 = arith.constant 0 : index
    %4 = vector.load %arg5[%c2, %c0_6] : memref<3x256xf32, #tpu.memory_space<vmem>>, vector<1x64xf32>
    %c0_7 = arith.constant 0 : index
    %c0_8 = arith.constant 0 : index
    %5 = vector.load %arg2[%c0_7, %c0_8] : memref<40x64xf32, #tpu.memory_space<vmem>>, vector<40x64xf32>
    %cst = arith.constant dense<0.000000e+00> : vector<8x64xf32>
    %6 = tpu.matmul %0, %5, %cst {dimension_numbers = #tpu.dot_dimension_numbers<[1], [0], [0], [1], [0, 0, 1, 1], [], []>} : vector<8x40xf32>, vector<40x64xf32>, vector<8x64xf32> -> vector<8x64xf32>
    %7 = vector.broadcast %2 : vector<1x64xf32> to vector<8x64xf32>
    %8 = arith.addf %6, %7 : vector<8x64xf32>
    %cst_9 = arith.constant 0.000000e+00 : f32
    %9 = vector.broadcast %cst_9 : f32 to vector<8x64xf32>
    %10 = arith.maximumf %8, %9 : vector<8x64xf32>
    %11 = tpu.concatenate %10, %1 in 1 : vector<8x64xf32>, vector<8x64xf32> -> vector<8x128xf32>
    %c0_10 = arith.constant 0 : index
    %c0_11 = arith.constant 0 : index
    %12 = vector.load %arg3[%c0_10, %c0_11] : memref<128x256xf32, #tpu.memory_space<vmem>>, vector<128x256xf32>
    %cst_12 = arith.constant dense<0.000000e+00> : vector<8x256xf32>
    %13 = tpu.matmul %11, %12, %cst_12 {dimension_numbers = #tpu.dot_dimension_numbers<[1], [0], [0], [1], [0, 0, 1, 1], [], []>} : vector<8x128xf32>, vector<128x256xf32>, vector<8x256xf32> -> vector<8x256xf32>
    %14 = vector.broadcast %3 : vector<1x256xf32> to vector<8x256xf32>
    %15 = arith.addf %13, %14 : vector<8x256xf32>
    %16 = vector.extract_strided_slice %15 {offsets = [0, 0], sizes = [8, 128], strides = [1, 1]} : vector<8x256xf32> to vector<8x128xf32>
    %17 = arith.negf %16 : vector<8x128xf32>
    %18 = math.exp %17 : vector<8x128xf32>
    %cst_13 = arith.constant 1.000000e+00 : f32
    %19 = vector.broadcast %cst_13 : f32 to vector<8x128xf32>
    %20 = arith.addf %19, %18 : vector<8x128xf32>
    %21 = arith.divf %19, %20 : vector<8x128xf32>
    %22 = vector.extract_strided_slice %21 {offsets = [0, 0], sizes = [8, 64], strides = [1, 1]} : vector<8x128xf32> to vector<8x64xf32>
    %23 = vector.extract_strided_slice %21 {offsets = [0, 64], sizes = [8, 64], strides = [1, 1]} : vector<8x128xf32> to vector<8x64xf32>
    %24 = vector.extract_strided_slice %15 {offsets = [0, 128], sizes = [8, 64], strides = [1, 1]} : vector<8x256xf32> to vector<8x64xf32>
    %25 = vector.extract_strided_slice %15 {offsets = [0, 192], sizes = [8, 64], strides = [1, 1]} : vector<8x256xf32> to vector<8x64xf32>
    %26 = arith.mulf %22, %25 : vector<8x64xf32>
    %27 = arith.addf %24, %26 : vector<8x64xf32>
    %28 = math.tanh %27 : vector<8x64xf32>
    %cst_14 = arith.constant 1.000000e+00 : f32
    %29 = vector.broadcast %cst_14 : f32 to vector<8x64xf32>
    %30 = arith.subf %29, %23 : vector<8x64xf32>
    %31 = arith.mulf %30, %28 : vector<8x64xf32>
    %32 = arith.mulf %23, %1 : vector<8x64xf32>
    %33 = arith.addf %31, %32 : vector<8x64xf32>
    %c0_15 = arith.constant 0 : index
    %c0_16 = arith.constant 0 : index
    %34 = vector.load %arg4[%c0_15, %c0_16] : memref<64x64xf32, #tpu.memory_space<vmem>>, vector<64x64xf32>
    %cst_17 = arith.constant dense<0.000000e+00> : vector<8x64xf32>
    %35 = tpu.matmul %33, %34, %cst_17 {dimension_numbers = #tpu.dot_dimension_numbers<[1], [0], [0], [1], [0, 0, 1, 1], [], []>} : vector<8x64xf32>, vector<64x64xf32>, vector<8x64xf32> -> vector<8x64xf32>
    %36 = vector.broadcast %4 : vector<1x64xf32> to vector<8x64xf32>
    %37 = arith.addf %35, %36 : vector<8x64xf32>
    %38 = tpu.concatenate %33, %37 in 1 : vector<8x64xf32>, vector<8x64xf32> -> vector<8x128xf32>
    %c0_18 = arith.constant 0 : index
    %c0_19 = arith.constant 0 : index
    %39 = vector.load %arg6[%c0_18, %c0_19] : memref<8x128xf32, #tpu.memory_space<vmem>>, vector<8x128xf32>
    tpu.vector_store %arg6[%c0_18, %c0_19], %38 {strides = array<i32>} : memref<8x128xf32, #tpu.memory_space<vmem>>, vector<8x128xf32>,
    return
  }
}

</mosaic_0001>

<bundles_post_ra>
// kernel: rnn_agent_forward.1
= control target key start
LH: loop header
LB: loop body
LE: loop exit
PB: predicated region body
PF: predicated region fallthrough
CT: control target
= control target key end

     0   :  { %11 = vsyncpa [#allocation3], 0  ;;  %s848_s0 = inlined_call_operand.hbm [shape: f32[8,40], index: 0, kind: input, shape index: {}]   ;;  %s849_s1 = inlined_call_operand.hbm [shape: f32[8,64], index: 1, kind: input, shape index: {}]   ;;  %s850_s2 = inlined_call_operand.hbm [shape: f32[40,64], index: 2, kind: input, shape index: {}]   ;;  %s851_s3 = inlined_call_operand.hbm [shape: f32[128,256], index: 3, kind: input, shape index: {}]   ;;  %s852_s4 = inlined_call_operand.hbm [shape: f32[64,64], index: 4, kind: input, shape index: {}]   ;;  %s853_s5 = inlined_call_operand.hbm [shape: f32[3,256], index: 5, kind: input, shape index: {}]   ;;  %s854_s6 = inlined_call_operand.vmem [shape: f32[8,128], index: 6, kind: output, shape index: {}]  }
   0x1   :  { %12 = vsyncpa [#allocation5], 0 }
   0x2   :  { %13 = vsyncpa [#allocation8], 0 }
   0x3   :  { %14 = vsyncpa [#allocation11], 0  ;;  %s694_s21 = smov [#allocation4]   ;;  %s695_s23 = smov [#allocation7]  }
   0x4   :  { %s31_s22 = sshll.u32 %s694_s21, 4  ;;  %s52_s24 = sshll.u32 %s695_s23, 4  ;;  %s32_s22 = int_to_ptr.vmem [resolvable:$true] %s31_s22  ;;  %s743_s24 = int_to_ptr.vmem [resolvable:$true] %s52_s24 }
   0x5   :  { %s554_s27 = scalar_lea.hbm %s849_s1, 128 }
   0x6   :  { %p555_p0 = scmp.ne.s32.totalorder %s849_s1, %s554_s27  ;;  %p558_p1 = scmp.lt.u32.totalorder %s554_s27, %s849_s1 }
   0x8   :  { %p560_p2 = pnand %p558_p1, %p555_p0 }
   0xa   :  { %563 = shalt.err (!%p560_p2)
}
   0xb   :  { %s564_s8 = scalar_lea.vmem %s32_s22, 128  ;;  %p569_p4 = scmp.lt.s32.totalorder %s32_s22, %s32_s22 }
   0xc   :  { %p565_p3 = scmp.ne.s32.totalorder %s32_s22, %s564_s8  ;;  %p570_p5 = scmp.lt.s32.totalorder %s564_s8, %s564_s8 }
   0xe   :  { %p571_p6 = por %p570_p5, %p569_p4 }
  0x10   :  { %p572_p7 = pnand %p571_p6, %p565_p3 }
  0x12   :  { %575 = shalt.err (!%p572_p7)
}
  0x13   :  { %34 = dma.hbm_to_vmem [thread:$0]  %s849_s1, 128, %s32_s22, [#allocation5]  }
  0x14   :  { %s576_s13 = scalar_lea.hbm %s851_s3, 4096 }
  0x15   :  { %p577_p8 = scmp.ne.s32.totalorder %s851_s3, %s576_s13  ;;  %p580_p9 = scmp.lt.u32.totalorder %s576_s13, %s851_s3 }
  0x17   :  { %p582_p10 = pnand %p580_p9, %p577_p8 }
  0x19   :  { %585 = shalt.err (!%p582_p10)
}
  0x1a   :  { %s586_s18 = scalar_lea.vmem %s743_s24, 4096  ;;  %p591_p12 = scmp.lt.s32.totalorder %s743_s24, %s743_s24 }
  0x1b   :  { %p587_p11 = scmp.ne.s32.totalorder %s743_s24, %s586_s18  ;;  %p592_p13 = scmp.lt.s32.totalorder %s586_s18, %s586_s18 }
  0x1d   :  { %p593_p0 = por %p592_p13, %p591_p12 }
  0x1f   :  { %p594_p1 = pnand %p593_p0, %p587_p11 }
  0x21   :  { %597 = shalt.err (!%p594_p1)
}
  0x22   :  { %s696_s1 = smov 256   ;;  %s697_s19 = smov 16  }
  0x23   :  { %58 = dma.hbm_to_vmem [thread:$0]  %s851_s3, 4096, %s743_s24, [#allocation8], %s696_s1, %s696_s1, %s697_s19  }
  0x24   :  { %s698_s22 = smov [#allocation2]   ;;  %s699_s25 = smov [#allocation6]  }
  0x25   :  { %s21_s23 = sshll.u32 %s698_s22, 4  ;;  %s40_s26 = sshll.u32 %s699_s25, 4  ;;  %s22_s23 = int_to_ptr.vmem [resolvable:$true] %s21_s23  ;;  %s774_s26 = int_to_ptr.vmem [resolvable:$true] %s40_s26 }
  0x26   :  { %s598_s29 = scalar_lea.hbm %s848_s0, 128 }
  0x27   :  { %p599_p2 = scmp.ne.s32.totalorder %s848_s0, %s598_s29  ;;  %p602_p3 = scmp.lt.u32.totalorder %s598_s29, %s848_s0 }
  0x29   :  { %p604_p4 = pnand %p602_p3, %p599_p2 }
  0x2b   :  { %607 = shalt.err (!%p604_p4)
}
  0x2c   :  { %s608_s3 = scalar_lea.vmem %s22_s23, 128  ;;  %p613_p6 = scmp.lt.s32.totalorder %s22_s23, %s22_s23 }
  0x2d   :  { %p609_p5 = scmp.ne.s32.totalorder %s22_s23, %s608_s3  ;;  %p614_p7 = scmp.lt.s32.totalorder %s608_s3, %s608_s3 }
  0x2f   :  { %p615_p8 = por %p614_p7, %p613_p6 }
  0x31   :  { %p616_p9 = pnand %p615_p8, %p609_p5 }
  0x33   :  { %619 = shalt.err (!%p616_p9)
}
  0x34   :  { %24 = dma.hbm_to_vmem [thread:$0]  %s848_s0, 128, %s22_s23, [#allocation3]  }
  0x35   :  { %s620_s13 = scalar_lea.hbm %s850_s2, 640 }
  0x36   :  { %p621_p10 = scmp.ne.s32.totalorder %s850_s2, %s620_s13  ;;  %p624_p11 = scmp.lt.u32.totalorder %s620_s13, %s850_s2 }
  0x38   :  { %p626_p12 = pnand %p624_p11, %p621_p10 }
  0x3a   :  { %629 = shalt.err (!%p626_p12)
}
  0x3b   :  { %s630_s18 = scalar_lea.vmem %s774_s26, 640  ;;  %p635_p0 = scmp.lt.s32.totalorder %s774_s26, %s774_s26 }
  0x3c   :  { %p631_p13 = scmp.ne.s32.totalorder %s774_s26, %s630_s18  ;;  %p636_p1 = scmp.lt.s32.totalorder %s630_s18, %s630_s18 }
  0x3e   :  { %p637_p2 = por %p636_p1, %p635_p0 }
  0x40   :  { %p638_p3 = pnand %p637_p2, %p631_p13 }
  0x42   :  { %641 = shalt.err (!%p638_p3)
}
  0x43   :  { %s700_s0 = smov 128   ;;  %s701_s1 = smov 8  }
  0x44   :  { %46 = dma.hbm_to_vmem [thread:$0]  %s850_s2, 640, %s774_s26, [#allocation5], %s700_s0, %s700_s0, %s701_s1  }
  0x45   :  { %s702_s21 = smov [#allocation9]   ;;  %s703_s23 = smov [#allocation10]  }
  0x46   :  { %s64_s22 = sshll.u32 %s702_s21, 4  ;;  %s77_s25 = sshll.u32 %s703_s23, 4  ;;  %s65_s22 = int_to_ptr.vmem [resolvable:$true] %s64_s22  ;;  %s78_s25 = int_to_ptr.vmem [resolvable:$true] %s77_s25 }
  0x47   :  { %s642_s29 = scalar_lea.hbm %s852_s4, 1024 }
  0x48   :  { %p643_p4 = scmp.ne.s32.totalorder %s852_s4, %s642_s29  ;;  %p646_p5 = scmp.lt.u32.totalorder %s642_s29, %s852_s4 }
  0x4a   :  { %p648_p6 = pnand %p646_p5, %p643_p4 }
  0x4c   :  { %651 = shalt.err (!%p648_p6)
}
  0x4d   :  { %s652_s2 = scalar_lea.vmem %s65_s22, 1024  ;;  %p657_p8 = scmp.lt.s32.totalorder %s65_s22, %s65_s22 }
  0x4e   :  { %p653_p7 = scmp.ne.s32.totalorder %s65_s22, %s652_s2  ;;  %p658_p9 = scmp.lt.s32.totalorder %s652_s2, %s652_s2 }
  0x50   :  { %p659_p10 = por %p658_p9, %p657_p8 }
  0x52   :  { %p660_p11 = pnand %p659_p10, %p653_p7 }
  0x54   :  { %663 = shalt.err (!%p660_p11)
}
  0x55   :  { %70 = dma.hbm_to_vmem [thread:$0]  %s852_s4, 1024, %s65_s22, [#allocation8], %s700_s0, %s700_s0, %s701_s1  }
  0x56   :  { %s664_s11 = scalar_lea.hbm %s853_s5, 128 }
  0x57   :  { %p665_p12 = scmp.ne.s32.totalorder %s853_s5, %s664_s11  ;;  %p668_p13 = scmp.lt.u32.totalorder %s664_s11, %s853_s5 }
  0x59   :  { %p670_p0 = pnand %p668_p13, %p665_p12 }
  0x5b   :  { %673 = shalt.err (!%p670_p0)
}
  0x5c   :  { %s674_s16 = scalar_lea.vmem %s78_s25, 128  ;;  %p679_p2 = scmp.lt.s32.totalorder %s78_s25, %s78_s25 }
  0x5d   :  { %p675_p1 = scmp.ne.s32.totalorder %s78_s25, %s674_s16  ;;  %p680_p3 = scmp.lt.s32.totalorder %s674_s16, %s674_s16 }
  0x5f   :  { %p681_p4 = por %p680_p3, %p679_p2 }
  0x61   :  { %p682_p5 = pnand %p681_p4, %p675_p1 }
  0x63   :  { %685 = shalt.err (!%p682_p5)
}
  0x64   :  { %80 = dma.hbm_to_vmem [thread:$0]  %s853_s5, 128, %s78_s25, [#allocation11]  }
  0x65   :  { %686 = dma.done.wait [#allocation3], 128  }
  0x66   :  { %687 = vsyncadd [#allocation3], 4294967168 }
  0x67   :  { %688 = dma.done.wait [#allocation5], 768  }
  0x68   :  { %689 = vsyncadd [#allocation5], 4294966528 }
  0x69   :  { %690 = dma.done.wait [#allocation8], 5120  }
  0x6a   :  { %691 = vsyncadd [#allocation8], 4294962176 }
  0x6b   :  { %692 = dma.done.wait [#allocation11], 128  }
  0x6c   :  { %693 = vsyncadd [#allocation11], 4294967168  ;;  %v704_v0 = vmov 0.0|0.0   ;;  %vm705_vm0 = vmmov 0   ;;  %v706_v1 = vmov 0.0   ;;  %v105_v2 = vld [vmem:[#allocation6] sm:$0xff] }
  0x6d   :  { %484 = vmatprep.subr.bf16.mxu0 %v704_v0  ;;  %462 = vmatprep.mubr.msk.f32.mxu0 %vm705_vm0, %v706_v1  ;;  %v106_v3 = vld [vmem:[#allocation6 + $0x8] sm:$0xff]  ;;  %v107_v4 = vld [vmem:[#allocation6 + $0x10] sm:$0xff]  ;;  %v108_v6 = vld [vmem:[#allocation6 + $0x18] sm:$0xff]  ;;  %s707_s5 = smov 64   ;;  %vm114_vm1 = vcmask 326656   ;;  %vm193_vm2 = vcmask 523264  }
  0x6e   :  { %302 = vmatprep.mubr.f32.mxu1 %v706_v1  ;;  %v485_v5 = vpack.c.bf16 %v106_v3, %v105_v2  ;;  %v100_v7 = vld [vmem:[#allocation4] sm:$0xff]  ;;  %v196_v8 = vld [vmem:[#allocation7 + $0x8] sm:$0xff]  ;;  %v198_v9 = vld [vmem:[#allocation7 + $0x18] sm:$0xff]  ;;  %v488_v10 = vpack.c.bf16 %v108_v6, %v107_v4  ;;  %v228_v3 = vlaneseq }
  0x6f   :  { %190 = vrot.lane.b32.xlu0 %v100_v7, %s707_s5  ;;  %v490_v11 = vpack.c.bf16 %v198_v9, %v196_v8  ;;  %v195_v12 = vld [vmem:[#allocation7] sm:$0xff]  ;;  %v197_v13 = vld [vmem:[#allocation7 + $0x10] sm:$0xff]  ;;  %v200_v14 = vld [vmem:[#allocation7 + $0x28] sm:$0xff] }
  0x70   :  { %486 = vmatpush3.bf16.msra.mxu0 %v485_v5  ;;  %v492_v15 = vpack.c.bf16 %v197_v13, %v195_v12  ;;  %v202_v16 = vld [vmem:[#allocation7 + $0x38] sm:$0xff]  ;;  %v199_v17 = vld [vmem:[#allocation7 + $0x20] sm:$0xff]  ;;  %v201_v18 = vld [vmem:[#allocation7 + $0x30] sm:$0xff]  ;;  %v229_v4 = vshrl.u32 %v228_v3, 7 }
  0x71   :  { %487 = vmatprep.subr.bf16.mxu0 %v704_v0  ;;  %491 = vmatprep.subr.bf16.mxu1 %v490_v11  ;;  %v494_v19 = vpack.c.bf16 %v202_v16, %v200_v14  ;;  %v204_v20 = vld [vmem:[#allocation7 + $0x48] sm:$0xff]  ;;  %v206_v21 = vld [vmem:[#allocation7 + $0x58] sm:$0xff]  ;;  %v496_v22 = vpack.c.bf16 %v201_v18, %v199_v17  ;;  %v203_v24 = vld [vmem:[#allocation7 + $0x40] sm:$0xff] }
  0x72   :  { %493 = vmatpush1.bf16.msra.mxu1 %v492_v15  ;;  %v498_v23 = vpack.c.bf16 %v206_v21, %v204_v20  ;;  %v205_v25 = vld [vmem:[#allocation7 + $0x50] sm:$0xff]  ;;  %v109_v26 = vld [vmem:[#allocation6 + $0x20] sm:$0xff]  ;;  %v208_v27 = vld [vmem:[#allocation7 + $0x68] sm:$0xff]  ;;  %v234_v5 = vsub.s32 1, %v229_v4  ;;  %v230_v11 = vsub.s32 0, %v229_v4 }
  0x73   :  { %495 = vmatprep.subr.bf16.mxu1 %v494_v19  ;;  %v210_v28 = vld [vmem:[#allocation7 + $0x78] sm:$0xff]  ;;  %v99_v29 = vld [vmem:[#allocation2] sm:$0xff]  ;;  %v500_v30 = vpack.c.bf16 %v205_v25, %v203_v24  ;;  %v207_v32 = vld [vmem:[#allocation7 + $0x60] sm:$0xff] }
  0x74   :  { %489 = vmatpush3.bf16.msra.mxu0 %v488_v10  ;;  %v502_v31 = vpack.c.bf16 %v210_v28, %v208_v27  ;;  %v209_v33 = vld [vmem:[#allocation7 + $0x70] sm:$0xff]  ;;  %v212_v34 = vld [vmem:[#allocation7 + $0x88] sm:$0xff]  ;;  %v214_v35 = vld [vmem:[#allocation7 + $0x98] sm:$0xff] }
  0x75   :  { %460 = vmatprep.subr.mxu0 %v706_v1  ;;  %v504_v36 = vpack.c.bf16 %v209_v33, %v207_v32  ;;  %v506_v37 = vpack.c.bf16 %v214_v35, %v212_v34  ;;  %v211_v38 = vld [vmem:[#allocation7 + $0x80] sm:$0xff]  ;;  %v213_v39 = vld [vmem:[#allocation7 + $0x90] sm:$0xff]  ;;  %v216_v40 = vld [vmem:[#allocation7 + $0xa8] sm:$0xff] }
  0x76   :  { %497 = vmatpush1.bf16.msra.mxu1 %v496_v22  ;;  %v218_v41 = vld [vmem:[#allocation7 + $0xb8] sm:$0xff]  ;;  %v508_v42 = vpack.c.bf16 %v213_v39, %v211_v38  ;;  %v215_v44 = vld [vmem:[#allocation7 + $0xa0] sm:$0xff]  ;;  %v217_v45 = vld [vmem:[#allocation7 + $0xb0] sm:$0xff] }
  0x77   :  { %499 = vmatprep.subr.bf16.mxu1 %v498_v23  ;;  %v510_v43 = vpack.c.bf16 %v218_v41, %v216_v40  ;;  %v220_v46 = vld [vmem:[#allocation7 + $0xc8] sm:$0xff]  ;;  %v222_v47 = vld [vmem:[#allocation7 + $0xd8] sm:$0xff]  ;;  %v512_v48 = vpack.c.bf16 %v217_v45, %v215_v44  ;;  %v219_v50 = vld [vmem:[#allocation7 + $0xc0] sm:$0xff] }
  0x78   :  { %461 = vmatpush3.msra.mxu0 %v109_v26  ;;  %v514_v49 = vpack.c.bf16 %v222_v47, %v220_v46  ;;  %v221_v51 = vld [vmem:[#allocation7 + $0xd0] sm:$0xff]  ;;  %v224_v53 = vld [vmem:[#allocation7 + $0xe8] sm:$0xff]  ;;  %v226_v54 = vld [vmem:[#allocation7 + $0xf8] sm:$0xff] }
  0x79   :  { %463 = vmatmul.mubr.msk.f32.vlgmr.msra.gmra.mrb[0].mxu0 %vm114_vm1, %v99_v29  ;;  %522 = vmatprep.subr.bf16.mxu0 %v704_v0  ;;  %v516_v52 = vpack.c.bf16 %v221_v51, %v219_v50  ;;  %v518_v55 = vpack.c.bf16 %v226_v54, %v224_v53  ;;  %v223_v56 = vld [vmem:[#allocation7 + $0xe0] sm:$0xff]  ;;  %v225_v57 = vld [vmem:[#allocation7 + $0xf0] sm:$0xff]  ;;  %v331_v22 = vld [vmem:[#allocation9 + $0x8] sm:$0xff] }
  0x7a   :  { %481 = vmatprep.mubr.msk.f32.mxu0 %vm705_vm0, %v706_v1  ;;  %501 = vmatpush1.bf16.msra.mxu1 %v500_v30  ;;  %v520_v58 = vpack.c.bf16 %v225_v57, %v223_v56  ;;  %v432_v59 = vld [vmem:[#allocation10] ss:$0 sm:$0xff]  ;;  %v103_v6 = vld [vmem:[#allocation10 + $0x1] ss:$4 sm:$0x3]  ;;  %v332_v23 = vld [vmem:[#allocation9 + $0x10] sm:$0xff] }
  0x7b   :  { %503 = vmatprep.subr.bf16.mxu1 %v502_v31  ;;  %v235_v7 = vrot.slane %v103_v6, %v234_v5  ;;  %v231_v12 = vrot.slane %v103_v6, %v230_v11  ;;  %v330_v21 = vld [vmem:[#allocation9] sm:$0xff]  ;;  %v333_v25 = vld [vmem:[#allocation9 + $0x18] sm:$0xff]  ;;  %v335_v28 = vld [vmem:[#allocation9 + $0x28] sm:$0xff] }
  0x7c   :  { %v523_v24 = vpack.c.bf16 %v331_v22, %v330_v21  ;;  %v526_v26 = vpack.c.bf16 %v333_v25, %v332_v23  ;;  %v334_v27 = vld [vmem:[#allocation9 + $0x20] sm:$0xff]  ;;  %v336_v31 = vld [vmem:[#allocation9 + $0x30] sm:$0xff]  ;;  %v337_v32 = vld [vmem:[#allocation9 + $0x38] sm:$0xff] }
  0x7d   :  { %v529_v29 = vpack.c.bf16 %v335_v28, %v334_v27  ;;  %v532_v33 = vpack.c.bf16 %v337_v32, %v336_v31  ;;  %v435_v40 = vld [vmem:[#allocation10 + $0x2] ss:$0 sm:$0xff] }
  0x7e   :  { %505 = vmatpush1.bf16.msra.mxu1 %v504_v36  ;;  %524 = vmatpush3.bf16.msra.mxu0 %v523_v24 }
  0x7f   :  { %507 = vmatprep.subr.bf16.mxu1 %v506_v37  ;;  %525 = vmatprep.subr.bf16.mxu0 %v704_v0 }
  0x82   :  { %509 = vmatpush1.bf16.msra.mxu1 %v508_v42  ;;  %527 = vmatpush3.bf16.msra.mxu0 %v526_v26 }
  0x83   :  { %511 = vmatprep.subr.bf16.mxu1 %v510_v43  ;;  %528 = vmatprep.subr.bf16.mxu0 %v704_v0 }
  0x86   :  { %513 = vmatpush1.bf16.msra.mxu1 %v512_v48  ;;  %530 = vmatpush3.bf16.msra.mxu0 %v529_v29 }
  0x87   :  { %515 = vmatprep.subr.bf16.mxu1 %v514_v49  ;;  %531 = vmatprep.subr.bf16.mxu0 %v704_v0 }
  0x8a   :  { %517 = vmatpush1.bf16.msra.mxu1 %v516_v52  ;;  %533 = vmatpush3.bf16.msra.mxu0 %v532_v33 }
  0x8b   :  { %519 = vmatprep.subr.bf16.mxu1 %v518_v55 }
  0x8e   :  { %521 = vmatpush1.bf16.msra.mxu1 %v520_v58 }
  0xe1   :  { %v191_v63 = vpop.permute.xlu0 %190 }
 0x14c   :  { %v184_v60 = vpop.f32.mrb[0].mxu0 }
 0x14d   :  { %v185_v61 = vadd.f32 %v432_v59, %v184_v60  ;;  %v464_v62 = vpop.f32.mrb[1].mxu0 }
 0x14f   :  { %v188_v1 = vmax.f32 %v185_v61, 0.0 }
 0x151   :  { %v194_v2 = vsel %vm193_vm2, %v188_v1, %v191_v63 }
 0x152   :  { %303 = vmatmul.mubr.f32.vlgmr.msra.gmra.mrb[0].mxu1 %v194_v2 }
 0x225   :  { %v304_v8 = vpop.f32.mrb[0].mxu1 }
 0x226   :  { %v306_v9 = vpop.f32.mrb[1].mxu1  ;;  %v305_v13 = vadd.f32 %v304_v8, %v231_v12 }
 0x227   :  { %v307_v10 = vadd.f32 %v306_v9, %v235_v7 }
 0x228   :  { %v434_v14 = vmul.f32 -1.442695, %v305_v13 }
 0x229   :  { %316 = vrot.lane.b32.xlu0 %v307_v10, %s707_s5 }
 0x22a   :  { %548 = vpow2.f32 %v434_v14 }
 0x234   :  { %v549_v15 = vpop.eup %548 }
 0x235   :  { %v312_v16 = vadd.f32 1.0, %v549_v15 }
 0x237   :  { %550 = vrcp.f32 %v312_v16 }
 0x241   :  { %v551_v17 = vpop.eup %550 }
 0x242   :  { %v322_v34 = vsub.f32 1.0, %v551_v17  ;;  %v328_v36 = vmul.f32 %v551_v17, %v191_v63 }
 0x29b   :  { %v317_v18 = vpop.permute.xlu0 %316 }
 0x29c   :  { %v319_v19 = vmul.f32 %v551_v17, %v317_v18 }
 0x29e   :  { %v320_v20 = vadd.f32 %v319_v19, %v307_v10 }
 0x2a0   :  { %552 = vtanh.f32 %v320_v20 }
 0x2aa   :  { %v553_v30 = vpop.eup %552 }
 0x2ab   :  { %324 = vrot.lane.b32.xlu1 %v553_v30, %s707_s5 }
 0x31d   :  { %v325_v35 = vpop.permute.xlu1 %324 }
 0x31e   :  { %v327_v37 = vmul.f32 %v325_v35, %v322_v34 }
 0x320   :  { %v329_v38 = vadd.f32 %v328_v36, %v327_v37 }
 0x322   :  { %343 = vrot.lane.b32.xlu1 %v329_v38, %s707_s5 }
 0x394   :  { %v344_v39 = vpop.permute.xlu1 %343 }
 0x395   :  { %482 = vmatmul.mubr.msk.f32.vlgmr.msra.gmra.mrb[2].mxu0 %vm193_vm2, %v344_v39 }
 0x468   :  { %v413_v41 = vpop.f32.mrb[2].mxu0 }
 0x469   :  { %v414_v42 = vadd.f32 %v435_v40, %v413_v41  ;;  %v483_v43 = vpop.f32.mrb[3].mxu0 }
 0x46b   :  { %419 = vrot.lane.b32.xlu0 %v414_v42, %s707_s5 }
 0x4dd   :  { %v420_v44 = vpop.permute.xlu0 %419 }
 0x4de   :  { %v422_v0 = vsel %vm193_vm2, %v344_v39, %v420_v44 }
 0x4df   :  { %423 = vst [vmem:[%s854_s6] sm:$0xff] %v422_v0 }
 0x4e0   :  { %428 = vsyncpa [#allocation3], 1 }
 0x4e1   :  { %429 = vsyncpa [#allocation5], 1 }
 0x4e2   :  { %430 = vsyncpa [#allocation8], 1 }
 0x4e3   :  { %431 = vsyncpa [#allocation11], 1 }

</bundles_post_ra>
